<compile_context>
chip_gen: v6e
topology: v6e:2x2x1
jax: 0.10.0
libtpu: 0.0.40
codegen_flags: <defaults>
</compile_context>

<pallas_src>
import functools

import jax
import jax.numpy as jnp
from jax.experimental import pallas as pl
from jax.experimental.pallas import tpu as pltpu


def _temporal_shift_kernel(x_ref, o_ref, *, fold, direction, shift_limit):
    """Block = (TB, T, tile_c) of the (B, T, C*spatial) tensor.

    Channels with global index < fold (and, for 'bidirectional', the second
    fold) are shifted along T with a zero boundary row; all other channels in
    the block pass straight through.  Blocks entirely outside the shifted
    channel range take a pure copy fast path.
    """
    tb, t, tile_c = x_ref.shape
    c_start = pl.program_id(1) * tile_c

    # ---- Fast path: channel tile entirely past the shifted fold region. ----
    @pl.when(c_start >= shift_limit)
    def _copy():
        o_ref[...] = x_ref[...]

    # ---- Slow path: tile overlaps the shifted fold region (few tiles). ----
    @pl.when(c_start < shift_limit)
    def _shift():
        # Lane-only channel coordinates; jnp.where broadcasts over T, so no
        # (T, tile_c) int32 iota / per-row compares are materialized.
        c_idx = c_start + jax.lax.broadcasted_iota(jnp.int32, (1, tile_c), 1)
        zero_row = jnp.zeros((1, tile_c), dtype=o_ref.dtype)

        def shifted(x, step):
            # step=+1: out[t] = x[t+1], boundary row T-1 -> 0
            # step=-1: out[t] = x[t-1], boundary row 0   -> 0
            if t == 1:
                return jnp.zeros_like(x)
            if step == 1:
                return jnp.concatenate([x[1:, :], zero_row], axis=0)
            return jnp.concatenate([zero_row, x[:-1, :]], axis=0)

        def apply(specs):
            # specs: static tuple of (step, lo, hi).  Masks hoisted out of the
            # per-batch loop (computed once per tile).
            masks = []
            for step, lo, hi in specs:
                m = c_idx < hi
                if lo > 0:
                    m = jnp.logical_and(m, c_idx >= lo)
                masks.append((step, m))

            def body(i, carry):
                x = x_ref[i]                      # (T, tile_c)
                out = x
                for step, m in masks:
                    out = jnp.where(m, shifted(x, step), out)
                o_ref[i] = out
                return carry

            if tb <= 8:
                for i in range(tb):               # short static unroll
                    body(i, 0)
            else:
                jax.lax.fori_loop(0, tb, body, 0)

        if direction == "left":
            apply(((1, 0, fold),))
        elif direction == "right":
            apply(((-1, 0, fold),))
        else:
            # bidirectional: first fold shifts left, second fold shifts right.
            # Gate the two shifts on which half this tile overlaps so tiles
            # spanning only one half don't compute / hold both shifted copies.
            needs_l = c_start < fold
            needs_r = c_start + tile_c > fold

            @pl.when(jnp.logical_and(needs_l, jnp.logical_not(needs_r)))
            def _left_only():
                apply(((1, 0, fold),))

            @pl.when(jnp.logical_and(needs_r, jnp.logical_not(needs_l)))
            def _right_only():
                apply(((-1, fold, 2 * fold),))

            @pl.when(jnp.logical_and(needs_l, needs_r))
            def _both():
                apply(((1, 0, fold), (-1, fold, 2 * fold)))


def _chip_budgets():
    """Returns (per-block byte budget, base VMEM limit), sized per generation."""
    cap = 64 << 20
    try:
        info = pltpu.get_tpu_info()
        cap = int(getattr(info, "vmem_capacity_bytes", cap) or cap)
    except Exception:
        pass
    if cap >= (128 << 20):          # v5e / v6e: 128 MiB physical VMEM
        return 16 << 20, 96 << 20
    return 4 << 20, 40 << 20        # v7x-class: 64 MiB VMEM, ~3.2 TB/s HBM


def _pick_tiles(B, T, Cf, itemsize, block_budget, vmem_limit):
    """Pick (batch_tile, channel_tile) so one block carries ~block_budget bytes."""
    per_chan = T * itemsize
    max_tc = max(128, (block_budget // per_chan) // 128 * 128)
    full_fits = 4 * Cf * per_chan + (4 << 20) <= vmem_limit

    if Cf % 128 != 0 or Cf <= max_tc:
        tc = Cf                       # full-extent channel block (always legal)
    else:
        tc = 128
        for cand in range(128, max_tc + 1, 128):
            if Cf % cand == 0:
                tc = cand
        # Cf's factorization can force a tiny tile (e.g. Cf = 128 * prime); a
        # full-extent channel block amortizes the ~0.35us/step overhead far
        # better, so take it whenever it still double-buffers inside VMEM.
        if tc * 8 <= max_tc and full_fits:
            tc = Cf

    tb = 1
    d = 2
    while d <= B:                     # batch blocking up to the budget
        if B % d == 0 and d * per_chan * tc <= block_budget:
            tb = d
        d += 1
    return tb, tc


def temporal_shift(x, fold_div=8, direction="left", *,
                   channel_tile=None, batch_tile=None, donate=True,
                   input_buffering=None):
    """Pallas TemporalShift. x: (B, T, C, *spatial) -> same shape.

    donate=True (default) aliases the input buffer to the output and runs the
    grid only over the shifted channel range; pass-through channels stay in
    place.  To actually avoid the pass-through HBM traffic the caller must
    donate the buffer (e.g. jax.jit(fn, donate_argnums=0)); otherwise XLA
    inserts a defensive copy (results stay correct).
    """
    assert x.ndim >= 3, "expected (B, T, C, ...)"
    assert direction in ("left", "right", "bidirectional")
    orig_shape = x.shape
    B, T, C = x.shape[:3]
    fold = C // fold_div

    spatial = 1
    for d in x.shape[3:]:
        spatial *= d
    Cf = C * spatial
    fold_flat = fold * spatial
    shift_limit = fold_flat if direction in ("left", "right") else 2 * fold_flat
    shift_limit = min(shift_limit, Cf)

    if donate and shift_limit == 0:
        return x                      # fold == 0 -> identity

    x3 = x.reshape(B, T, Cf)
    itemsize = jnp.dtype(x3.dtype).itemsize

    block_budget, vmem_limit = _chip_budgets()
    tb, tc = _pick_tiles(B, T, Cf, itemsize, block_budget, vmem_limit)

    if channel_tile is not None:
        tc = int(channel_tile)
    assert tc == Cf or (Cf % tc == 0 and tc % 128 == 0), (
        "channel_tile must divide the flattened channel dim and be a multiple of 128")

    if donate:
        n_ct = -(-shift_limit // tc)  # only tiles touching the fold region
    else:
        n_ct = Cf // tc

    if batch_tile is not None:
        tb = int(batch_tile)
    else:
        # Keep >= 2 grid steps when possible so both v7x TensorCores get work.
        while tb > 1 and (B // tb) * n_ct < 2:
            tb -= 1
            while B % tb:
                tb -= 1
    assert B % tb == 0
    nb = B // tb

    block_bytes = tb * T * tc * itemsize
    vmem_limit = max(vmem_limit, 4 * block_bytes + (4 << 20))

    kernel = functools.partial(
        _temporal_shift_kernel,
        fold=fold_flat, direction=direction, shift_limit=shift_limit)

    index_map = lambda b, c: (b, 0, c)
    if input_buffering is None:
        in_spec = pl.BlockSpec((tb, T, tc), index_map)
    else:  # secondary knob: deeper input buffering for long sequential grids
        in_spec = pl.BlockSpec((tb, T, tc), index_map,
                               pipeline_mode=pl.Buffered(int(input_buffering)))
    out_spec = pl.BlockSpec((tb, T, tc), index_map)

    bytes_accessed = 2 * nb * n_ct * block_bytes
    out = pl.pallas_call(
        kernel,
        out_shape=jax.ShapeDtypeStruct((B, T, Cf), x3.dtype),
        grid_spec=pltpu.PrefetchScalarGridSpec(
            num_scalar_prefetch=0,
            grid=(nb, n_ct),
            in_specs=[in_spec],
            out_specs=out_spec,
        ),
        compiler_params=pltpu.CompilerParams(
            dimension_semantics=("parallel", "parallel"),
            vmem_limit_bytes=int(vmem_limit)),
        cost_estimate=pl.CostEstimate(
            flops=0, transcendentals=0, bytes_accessed=int(bytes_accessed)),
        input_output_aliases={0: 0} if donate else {},
    )(x3)

    return out.reshape(orig_shape)


def _reference_shift(x, fold_div=8, direction="left"):
    # Pure-JAX reference mirroring the PyTorch code (works for ND input).
    c = x.shape[2]
    fold = c // fold_div
    out = jnp.zeros_like(x)
    if direction == "left":
        out = out.at[:, :-1, :fold].set(x[:, 1:, :fold])
        out = out.at[:, :, fold:].set(x[:, :, fold:])
    elif direction == "right":
        out = out.at[:, 1:, :fold].set(x[:, :-1, :fold])
        out = out.at[:, :, fold:].set(x[:, :, fold:])
    else:
        out = out.at[:, :-1, :fold].set(x[:, 1:, :fold])
        out = out.at[:, 1:, fold:2 * fold].set(x[:, :-1, fold:2 * fold])
        out = out.at[:, :, 2 * fold:].set(x[:, :, 2 * fold:])
    return out


if __name__ == "__main__":
    key = jax.random.PRNGKey(0)
    ok = True

    shapes = [
        (2, 8, 32),           # tiny (B, T, C); Cf=32 -> full-extent channel block
        (2, 8, 64, 4, 4),     # (B, T, C, H, W); Cf=1024 -> lane-dense tiling
        (4, 8, 16, 8, 8),     # larger batch; exercises batch blocking (TB > 1)
    ]
    xs = [jax.random.normal(jax.random.fold_in(key, i), s, dtype=jnp.float32)
          for i, s in enumerate(shapes)]

    def check(y, y_ref):
        return bool(jnp.allclose(y, y_ref, atol=1e-6))

    for direction in ("left", "right", "bidirectional"):
        for x in xs:
            y_ref = _reference_shift(x, fold_div=8, direction=direction)

            # Primary (donated / in-place) path: grid covers only fold tiles.
            y = jax.block_until_ready(temporal_shift(x, 8, direction))
            ok &= check(y, y_ref)

            # Full-coverage path (no aliasing): copy fast path + shift tiles.
            y_f = jax.block_until_ready(
                temporal_shift(x, 8, direction, donate=False))
            ok &= check(y_f, y_ref)

            cf = x.shape[2]
            for d in x.shape[3:]:
                cf *= d
            if cf % 256 == 0:
                # Force a multi-tile channel grid (shift tile(s) + copy tiles)
                # with batch blocking, both with and without donation.
                y_t = jax.block_until_ready(
                    temporal_shift(x, 8, direction, channel_tile=128, donate=False))
                ok &= check(y_t, y_ref)
                y_td = jax.block_until_ready(
                    temporal_shift(x, 8, direction, channel_tile=128, donate=True))
                ok &= check(y_td, y_ref)

    if ok:
        print("KERNEL_OK")
    else:
        print("MISMATCH")
</pallas_src>

<mosaic_0001>
module attributes {stable_mosaic.version = 11 : i64} {
  func.func @_temporal_shift_kernel(%arg0: i32, %arg1: i32, %arg2: memref<1x8x32xf32, #tpu.memory_space<vmem>>, %arg3: memref<1x8x32xf32, #tpu.memory_space<vmem>>) attributes {dimension_semantics = [#tpu.dimension_semantics<parallel>, #tpu.dimension_semantics<parallel>], iteration_bounds = array<i64: 2, 1>, scalar_prefetch = 0 : i64, scratch_operands = 0 : i64, tpu.core_type = #tpu.core_type<tc>, window_params = [{transform_indices = @transform_0, window_bounds = array<i64: 1, 8, 32>}, {transform_indices = @transform_1, window_bounds = array<i64: 1, 8, 32>}]} {
    %c32_i32 = arith.constant 32 : i32
    %0 = arith.muli %arg1, %c32_i32 : i32
    %c4_i32 = arith.constant 4 : i32
    %1 = arith.cmpi sge, %0, %c4_i32 : i32
    %2 = arith.extui %1 : i1 to i32
    %c0_i32 = arith.constant 0 : i32
    %3 = arith.cmpi ne, %2, %c0_i32 : i32
    scf.if %3 {
      %c0 = arith.constant 0 : index
      %c0_2 = arith.constant 0 : index
      %c0_3 = arith.constant 0 : index
      %7 = vector.load %arg2[%c0, %c0_2, %c0_3] : memref<1x8x32xf32, #tpu.memory_space<vmem>>, vector<1x8x32xf32>
      %c0_4 = arith.constant 0 : index
      %c0_5 = arith.constant 0 : index
      %c0_6 = arith.constant 0 : index
      %8 = vector.load %arg3[%c0_4, %c0_5, %c0_6] : memref<1x8x32xf32, #tpu.memory_space<vmem>>, vector<1x8x32xf32>
      tpu.vector_store %arg3[%c0_4, %c0_5, %c0_6], %7 {strides = array<i32>} : memref<1x8x32xf32, #tpu.memory_space<vmem>>, vector<1x8x32xf32>,
    } else {
    }
    %c4_i32_0 = arith.constant 4 : i32
    %4 = arith.cmpi slt, %0, %c4_i32_0 : i32
    %5 = arith.extui %4 : i1 to i32
    %c0_i32_1 = arith.constant 0 : i32
    %6 = arith.cmpi ne, %5, %c0_i32_1 : i32
    scf.if %6 {
      %7 = tpu.iota {dimensions = array<i32: 1>} : vector<1x32xi32>
      %8 = vector.broadcast %0 : i32 to vector<1x32xi32>
      %9 = arith.addi %8, %7 : vector<1x32xi32>
      %cst = arith.constant 0.000000e+00 : f32
      %10 = vector.broadcast %cst : f32 to vector<1x32xf32>
      %c4_i32_2 = arith.constant 4 : i32
      %11 = vector.broadcast %c4_i32_2 : i32 to vector<1x32xi32>
      %12 = arith.cmpi slt, %9, %11 : vector<1x32xi32>
      %c0 = arith.constant 0 : index
      %c0_3 = arith.constant 0 : index
      %c0_4 = arith.constant 0 : index
      %13 = vector.load %arg2[%c0, %c0_3, %c0_4] : memref<1x8x32xf32, #tpu.memory_space<vmem>>, vector<1x8x32xf32>
      %14 = vector.shape_cast %13 : vector<1x8x32xf32> to vector<8x32xf32>
      %15 = vector.extract_strided_slice %14 {offsets = [1, 0], sizes = [7, 32], strides = [1, 1]} : vector<8x32xf32> to vector<7x32xf32>
      %16 = tpu.concatenate %15, %10 in 0 : vector<7x32xf32>, vector<1x32xf32> -> vector<8x32xf32>
      %17 = vector.shape_cast %12 : vector<1x32xi1> to vector<1x32xi1>
      %18 = vector.broadcast %17 : vector<1x32xi1> to vector<8x32xi1>
      %19 = arith.select %18, %16, %14 : vector<8x32xi1>, vector<8x32xf32>
      %c0_5 = arith.constant 0 : index
      %c0_6 = arith.constant 0 : index
      %c0_7 = arith.constant 0 : index
      %20 = vector.load %arg3[%c0_5, %c0_6, %c0_7] : memref<1x8x32xf32, #tpu.memory_space<vmem>>, vector<1x8x32xf32>
      %21 = vector.shape_cast %20 : vector<1x8x32xf32> to vector<8x32xf32>
      %22 = vector.shape_cast %19 : vector<8x32xf32> to vector<1x8x32xf32>
      tpu.vector_store %arg3[%c0_5, %c0_6, %c0_7], %22 {strides = array<i32>} : memref<1x8x32xf32, #tpu.memory_space<vmem>>, vector<1x8x32xf32>,
    } else {
    }
    return
  }
  func.func @transform_0(%arg0: i32, %arg1: i32) -> (i32, i32, i32) {
    %c0_i32 = arith.constant 0 : i32
    %c0_i32_0 = arith.constant 0 : i32
    return %arg0, %c0_i32, %arg1 : i32, i32, i32
  }
  func.func @transform_1(%arg0: i32, %arg1: i32) -> (i32, i32, i32) {
    %c0_i32 = arith.constant 0 : i32
    %c0_i32_0 = arith.constant 0 : i32
    return %arg0, %c0_i32, %arg1 : i32, i32, i32
  }
}

</mosaic_0001>

<bundles_post_ra>
// kernel: tpu_custom_call.1
= control target key start
LH: loop header
LB: loop body
LE: loop exit
PB: predicated region body
PF: predicated region fallthrough
CT: control target
= control target key end

     0   :  { %6 = vsyncpa [#allocation3], 0  ;;  %s609_s0 = inlined_call_operand.hbm [shape: f32[2,8,32], index: 0, kind: input, shape index: {}, may-alias: {0,1}]   ;;  %s610_s1 = inlined_call_operand.hbm [shape: f32[2,8,32], index: 1, kind: output, shape index: {}, may-alias: {0,1}]  }
   0x1   :  { %8 = vsyncpa [#allocation3 + $0x1], 0 }
   0x2   :  { %9 = vsyncpa [#allocation4], 0 }
   0x3   :  { %11 = vsyncpa [#allocation4 + $0x1], 0  ;;  %s469_s6 = smov 0   ;;  %s471_s7 = smov 0  }
   0x4   :  { %s473_s8 = smov 0   ;;  %s475_s9 = smov 0  }
   0x5   :  { %s477_s10 = smov 0   ;;  %s479_s11 = smov 0  }
   0x6 LB: > { %s272_s12 = sadd.s32 4294967295, %s455_s11   ;;  %s273_s13 = sadd.s32 4294967294, %s455_s11   ;;  %s455_s11 = sphi %s479_s11, %s17_s11   ;;  %s451_s10 = sphi %s477_s10, %s622_s10   ;;  %s447_s9 = sphi %s475_s9, %s621_s9   ;;  %s443_s8 = sphi %s473_s8, %s620_s8   ;;  %s439_s7 = sphi %s471_s7, %s619_s7   ;;  %s435_s6 = sphi %s469_s6, %s618_s6  }
   0x7   : > { %s29_s14 = sadd.s32 1, %s451_s10  ;;  %s38_s15 = sadd.s32 1, %s443_s8 }
   0x8   : > { %p31_p0 = scmp.ge.s32.totalorder %s29_s14, 2  ;;  %p45_p1 = scmp.ne.s32.totalorder %s443_s8, %s439_s7 }
   0x9   : > { %p46_p2 = scmp.eq.s32.totalorder %s455_s11, 0  ;;  %p51_p3 = scmp.ne.s32.totalorder %s439_s7, %s435_s6 }
   0xa   : > { %s624_s14 = smov (%p31_p0, %s29_s14), 0  ;;  %p52_p5 = scmp.eq.s32.totalorder %s272_s12, 0 }
   0xb   : > { %p510_p4 = por %p46_p2, %p45_p1  ;;  %s33_s17 = ssub.s32 %s451_s10, %s624_s14 }
   0xc   : > { %p77_p6 = scmp.eq.s32.totalorder %s272_s12, 1  ;;  %p36_p7 = scmp.eq.s32.totalorder %s33_s17, 0 }
   0xd   : > { %p516_p8 = por %p52_p5, %p51_p3  ;;  %p83_p10 = scmp.eq.s32.totalorder %s273_s13, 1 }
   0xe   : > { %p520_p9 = por %p77_p6, %p45_p1  ;;  %p297_p13 = scmp.lt.s32.totalorder %s455_s11, 2 }
   0xf   : > { %s525_s20 = scalar_select %p36_p7, %s443_s8, %s38_s15  }
  0x10   : > { %p527_p11 = por %p83_p10, %p51_p3  ;;  %s103_s22 = sand.u32 1, %s443_s8  }
  0x11   : > { %s276_s23 = sshll.u32 %s103_s22, 3  ;;  %s277_s24 = sshll.u32 %s451_s10, 7 }
  0x12   : > { %s614_s21 = scalar_select %p527_p11, 1, 0 }
  0x13   : > { %s113_s27 = scalar_lea.hbm %s609_s0, %s277_s24  ;;  %s107_s28 = scalar_lea.vmem [#allocation2], %s276_s23 }
  0x14   : > { %s115_s29 = sshll.u32 %s107_s28, 4  ;;  %p540_p0 = pnand %p297_p13, %p510_p4  ;;  %s116_s29 = int_to_ptr.vmem [resolvable:$true] %s115_s29 }
  0x15   : > { %p278_p1 = scmp.ge.s32.totalorder %s455_s11, 1  ;;  %p120_p2 = scmp.lt.s32.totalorder %s455_s11, 3 }
  0x16   : > { %s104_s2 = scalar_lea.sflag [#allocation3], %s103_s22  ;;  %p349_p3 = pneg %p540_p0 }
  0x17   : > { %s360_s3 = scalar_lea.vmem %s116_s29, 128  ;;  %s457_s4 = smov [#allocation2]  }
  0x18   : > { %p361_p5 = scmp.ne.s32.totalorder %s116_s29, %s360_s3  ;;  %s365_s5 = sshll.u32 %s457_s4, 4  ;;  %s366_s5 = int_to_ptr.vmem [resolvable:$false] %s365_s5 }
  0x19   : > { %s367_s12 = scalar_lea.vmem %s366_s5, 256  ;;  %p368_p10 = scmp.lt.s32.totalorder %s116_s29, %s366_s5 }
  0x1a   : > { %p363_p6 = pnand %p361_p5, %p349_p3  ;;  %p369_p12 = scmp.lt.s32.totalorder %s367_s12, %s360_s3 }
  0x1c   : > { %p364_p7 = pneg %p363_p6  ;;  %p370_p4 = por %p369_p12, %p368_p10 }
  0x1e   : > { %p371_p13 = pnand %p370_p4, %p364_p7 }
  0x20   : > { %374 = shalt.err (!%p371_p13)
}
  0x21   : > { %292 = dma.hbm_to_vmem [thread:$0]  (!%p540_p0), %s113_s27, 128, %s116_s29, %s104_s2  }
  0x22   : > { %p121_p11 = pnand %p278_p1, %p120_p2 }
  0x23   : > { %s555_s13 = sand.u32 (!%p121_p11), 1, %s439_s7  }
  0x24   : > { %124 = sbr.rel (%p121_p11) target bundleno = 66 (0x42), region = 24  ;;  %s279_s15 = sshll.u32 (!%p121_p11), %s555_s13, 3 }
  0x25   : > { %s127_s16 = scalar_lea.sflag (!%p121_p11), [#allocation3], %s555_s13  ;;  %s130_s17 = scalar_lea.vmem (!%p121_p11), [#allocation2], %s279_s15 }
  0x29   : > { %426 = dma.done.wait (%p516_p8), %s127_s16, 128  }
  0x2a   : > { %428 = vsyncadd (%p516_p8), %s127_s16, 4294967168  ;;  %v161_v0 = vlaneseq  ;;  %v166_v2 = vld [vmem:[%s130_s17] sm:$0xff]  ;;  %vm170_vm0 = vcmask 1046528   ;;  %s148_s22 = scalar_lea.vmem [#allocation5], %s279_s15  ;;  %s282_s24 = sshll.u32 %s447_s9, 7  ;;  %vm175_vm2 = vcmask 261120  }
  0x2b   : > { %s192_s23 = sshll.u32 %s148_s22, 4  ;;  %v168_v3 = vrot.slane %v166_v2, 1  ;;  %s190_s18 = scalar_lea.hbm %s610_s1, %s282_s24  ;;  %s564_s23 = int_to_ptr.vmem [resolvable:$true] %s192_s23 }
  0x2c   : > { %v162_v1 = vand.u32 127, %v161_v0  ;;  %s178_s27 = scalar_lea.sflag [#allocation4], %s555_s13  ;;  %s375_s28 = scalar_lea.vmem %s564_s23, 128 }
  0x2d   : > { %v171_v4 = vsel %vm170_vm0, %v168_v3, 0.0  ;;  %p376_p8 = scmp.ne.s32.totalorder %s564_s23, %s375_s28  ;;  %s458_s9 = smov [#allocation5]  }
  0x2e   : > { %vm165_vm1 = vcmp.lt.s32.totalorder %v162_v1, 4  ;;  %s379_s29 = sshll.u32 %s458_s9, 4  ;;  %s380_s29 = int_to_ptr.vmem [resolvable:$false] %s379_s29 }
  0x2f   : > { %v174_v5 = vsel %vm165_vm1, %v171_v4, %v166_v2  ;;  %p377_p11 = pnand %p376_p8, %p520_p9  ;;  %s381_s30 = scalar_lea.vmem %s380_s29, 256 }
  0x30   : > { %176 = vst.msk [vmem:[%s148_s22] sm:$0xff] %vm175_vm2, %v174_v5  ;;  %p382_p0 = scmp.lt.s32.totalorder %s564_s23, %s380_s29  ;;  %p383_p1 = scmp.lt.s32.totalorder %s381_s30, %s375_s28 }
  0x31   : > { %p378_p12 = pneg %p377_p11 }
  0x32   : > { %p384_p2 = por %p383_p1, %p382_p0 }
  0x34   : > { %p385_p3 = pnand %p384_p2, %p378_p12 }
  0x36   : > { %388 = shalt.err (!%p385_p3)
}
  0x37   : > { %s389_s2 = scalar_lea.hbm %s190_s18, 128  ;;  %s393_s5 = scalar_lea.hbm %s610_s1, 256 }
  0x38   : > { %p390_p5 = scmp.ne.s32.totalorder %s190_s18, %s389_s2  ;;  %p394_p10 = scmp.lt.s32.totalorder %s190_s18, %s610_s1 }
  0x39   : > { %p395_p4 = scmp.lt.s32.totalorder %s393_s5, %s389_s2 }
  0x3a   : > { %p391_p6 = pnand %p390_p5, %p520_p9 }
  0x3b   : > { %p396_p13 = por %p395_p4, %p394_p10 }
  0x3c   : > { %p392_p7 = pneg %p391_p6 }
  0x3e   : > { %p397_p8 = pnand %p396_p13, %p392_p7 }
  0x40   : > { %400 = shalt.err (!%p397_p8)
}
  0x41   : > { %287 = dma.vmem_to_hbm [thread:$0]  (%p520_p9), %s564_s23, 128, %s190_s18, %s178_s27  }
  0x42 PF: > { %s204_s15 = sand.u32 1, %s435_s6   ;;  %p616_p11 = scmp.ne.s32.totalorder %s614_s21, 0 }
  0x43   : > { %p617_p12 = scmp.ge.s32.totalorder %s455_s11, 2  ;;  %s205_s16 = scalar_lea.sflag [#allocation4], %s204_s15 }
  0x45   : > { %p294_p0 = pnand %p617_p12, %p616_p11 }
  0x47   : > { %p295_p1 = pneg %p294_p0 }
  0x49   : > { %430 = dma.done.wait (%p295_p1), %s205_s16, 128  }
  0x4a   : > { %432 = vsyncadd (%p295_p1), %s205_s16, 4294967168  ;;  %s17_s11 = sadd.s32 1, %s455_s11   ;;  %s618_s6 = smov %s439_s7 }
  0x4b   : > { %p14_p2 = scmp.ge.s32.totalorder %s17_s11, 4   ;;  %s619_s7 = smov %s443_s8 }
  0x4c   : > { %s620_s8 = smov %s525_s20  ;;  %s621_s9 = smov %s451_s10 }
  0x4d   : > { %s622_s10 = smov %s624_s14  ;;  %16 = sbr.rel (!%p14_p2) target bundleno = 6 (0x6), region = 77 }
  0x52   :  { %210 = vsyncpa [#allocation3], 1 }
  0x53   :  { %212 = vsyncpa [#allocation3 + $0x1], 1 }
  0x54   :  { %213 = vsyncpa [#allocation4], 1 }
  0x55   :  { %215 = vsyncpa [#allocation4 + $0x1], 1 }

</bundles_post_ra>
